<compile_context>
chip_gen: v7x
topology: tpu7x:2x2x1
jax: 0.10.0
libtpu: 0.0.40
codegen_flags: <defaults>
</compile_context>

<pallas_src>
import functools

import jax
import jax.numpy as jnp
from jax.experimental import pallas as pl
from jax.experimental.pallas import tpu as pltpu

OUT_PAD = 128  # lane-dense output slab; real outputs are columns 0 (angular) and 1 (linear)


def actor_kernel(s_ref, w1_ref, b1_ref, w2_ref, b2_ref, wa_ref, wl_ref, bh_ref, o_ref):
    # fc1 + tanh   (bf16 operands, f32 MXU accumulation)
    x = jnp.tanh(
        jnp.dot(s_ref[...], w1_ref[...], preferred_element_type=jnp.float32)
        + b1_ref[...]
    )
    # fc2 + tanh
    x = jnp.tanh(
        jnp.dot(x.astype(jnp.bfloat16), w2_ref[...],
                preferred_element_type=jnp.float32)
        + b2_ref[...]
    )
    # Heads: broadcast-multiply + lane reduce (VPU/XLU) — skips an N=2 MXU pass
    # and keeps the transcendentals (EUP) to a single lane per head.
    ha = jnp.sum(x * wa_ref[...], axis=-1, keepdims=True) + bh_ref[0]   # [TB, 1]
    hl = jnp.sum(x * wl_ref[...], axis=-1, keepdims=True) + bh_ref[1]   # [TB, 1]
    ang = jnp.tanh(ha)                      # angular head
    lin = 2.5 * jax.nn.softplus(hl)         # linear head
    # Lane-dense store: col 0 = angular, col 1 = linear, remaining lanes zero.
    col = jax.lax.broadcasted_iota(jnp.int32, o_ref.shape, 1)
    o_ref[...] = jnp.where(col == 0, ang, jnp.where(col == 1, lin, 0.0))


def _round_up(n, m):
    return ((n + m - 1) // m) * m


@functools.partial(jax.jit, static_argnames=("tile_b",))
def actor_forward(state, params, *, tile_b=128):
    """state: [B, state_dim] float. Returns [B, 2] f32 = concat(angular, linear).

    tile_b: batch tile (MXU M dimension). 128 suits v5e; use 256 on v6e/v7x.
    """
    w1, b1, w2, b2, wa, wl, bh = params
    B, S = state.shape
    H = w1.shape[1]

    # Shrink the tile for tiny batches (keeps the block a multiple of 8 or full).
    tile_b = min(tile_b, _round_up(max(B, 1), 8))
    b_pad = _round_up(B, tile_b)

    s = state.astype(jnp.bfloat16)
    if b_pad != B:
        s = jnp.pad(s, ((0, b_pad - B), (0, 0)))

    grid = (b_pad // tile_b,)

    def resident(shape):
        # Constant block index across the grid -> weights stay in VMEM (no re-DMA).
        return pl.BlockSpec(shape, lambda i: tuple(0 for _ in shape))

    out = pl.pallas_call(
        actor_kernel,
        out_shape=jax.ShapeDtypeStruct((b_pad, OUT_PAD), jnp.float32),
        grid=grid,
        in_specs=[
            pl.BlockSpec((tile_b, S), lambda i: (i, 0)),        # state tile (pipelined)
            resident((S, H)),                                   # fc1 weight [in, out] bf16
            resident((1, H)),                                   # fc1 bias f32
            resident((H, H)),                                   # fc2 weight bf16
            resident((1, H)),                                   # fc2 bias f32
            resident((1, H)),                                   # angular head weight f32
            resident((1, H)),                                   # linear head weight f32
            pl.BlockSpec(memory_space=pltpu.MemorySpace.SMEM),  # head biases (2,) f32
        ],
        out_specs=pl.BlockSpec((tile_b, OUT_PAD), lambda i: (i, 0)),
        compiler_params=pltpu.CompilerParams(
            dimension_semantics=("parallel",),   # megacore sharding on v7x
            vmem_limit_bytes=16 * 1024 * 1024,
        ),
    )(s, w1, b1, w2, b2, wa, wl, bh)

    return out[:B, :2]


def orthogonal_init(key, rows, cols, gain):
    """Mimics torch.nn.init.orthogonal_(gain) for a (rows, cols) matrix."""
    big, small = max(rows, cols), min(rows, cols)
    a = jax.random.normal(key, (big, small), dtype=jnp.float32)
    q, r = jnp.linalg.qr(a)
    d = jnp.sign(jnp.diagonal(r))
    q = q * d[None, :]
    if rows < cols:
        q = q.T
    return gain * q[:rows, :cols]


def make_actor_params(key, state_dim, hidden_dim=128):
    """Deterministic init matching init_weights_actor (orthogonal gain=0.01, bias=0).
    fc weights are stored transposed ([in, out]) and in bf16 for the MXU;
    the two 1-wide head weights are kept as f32 rows for the VPU/XLU head path."""
    k1, k2, k3, k4 = jax.random.split(key, 4)
    # torch Linear weights are (out, in); init in that shape, then transpose.
    w1 = orthogonal_init(k1, hidden_dim, state_dim, 0.01).T.astype(jnp.bfloat16)   # [S, H]
    w2 = orthogonal_init(k2, hidden_dim, hidden_dim, 0.01).T.astype(jnp.bfloat16)  # [H, H]
    wa = orthogonal_init(k3, 1, hidden_dim, 0.01).astype(jnp.float32)              # [1, H] angular
    wl = orthogonal_init(k4, 1, hidden_dim, 0.01).astype(jnp.float32)              # [1, H] linear
    b1 = jnp.zeros((1, hidden_dim), jnp.float32)
    b2 = jnp.zeros((1, hidden_dim), jnp.float32)
    bh = jnp.zeros((2,), jnp.float32)  # [angular_bias, linear_bias]
    return (w1, b1, w2, b2, wa, wl, bh)


def actor_reference_matched(state, params):
    """Pure-JAX reference following the kernel's exact dtype path (bf16 matmuls)."""
    w1, b1, w2, b2, wa, wl, bh = params
    x = jnp.tanh(jnp.dot(state.astype(jnp.bfloat16), w1,
                         preferred_element_type=jnp.float32) + b1)
    x = jnp.tanh(jnp.dot(x.astype(jnp.bfloat16), w2,
                         preferred_element_type=jnp.float32) + b2)
    ha = jnp.sum(x * wa, axis=-1, keepdims=True) + bh[0]
    hl = jnp.sum(x * wl, axis=-1, keepdims=True) + bh[1]
    return jnp.concatenate([jnp.tanh(ha), 2.5 * jax.nn.softplus(hl)], axis=-1)


def actor_reference_f32(state, params):
    """Full-f32 reference (the PyTorch module's math)."""
    w1, b1, w2, b2, wa, wl, bh = params
    x = jnp.tanh(state @ w1.astype(jnp.float32) + b1)
    x = jnp.tanh(x @ w2.astype(jnp.float32) + b2)
    ha = x @ wa.T + bh[0]
    hl = x @ wl.T + bh[1]
    return jnp.concatenate([jnp.tanh(ha), 2.5 * jax.nn.softplus(hl)], axis=-1)


if __name__ == "__main__":
    key = jax.random.PRNGKey(0)
    k_params, k_s1, k_s2 = jax.random.split(key, 3)

    STATE_DIM, HIDDEN = 16, 128
    params = make_actor_params(k_params, STATE_DIM, HIDDEN)

    # Small batch (single grid step, shrunk tile).
    state_small = jax.random.normal(k_s1, (8, STATE_DIM), dtype=jnp.float32)
    out_small = jax.block_until_ready(actor_forward(state_small, params))
    assert out_small.shape == (8, 2)

    # Larger batch exercising multiple grid steps + tail padding.
    state_big = jax.random.normal(k_s2, (260, STATE_DIM), dtype=jnp.float32)
    out_big = jax.block_until_ready(actor_forward(state_big, params))
    assert out_big.shape == (260, 2)

    for state, out in ((state_small, out_small), (state_big, out_big)):
        ref_m = actor_reference_matched(state, params)
        ref_f = actor_reference_f32(state, params)
        assert jnp.allclose(out, ref_m, atol=1e-3, rtol=1e-3), \
            "mismatch vs matched-path (bf16 matmul) reference"
        assert jnp.allclose(out, ref_f, atol=2e-2, rtol=2e-2), \
            "mismatch vs full-f32 reference"

    print("KERNEL_OK")
</pallas_src>

<mosaic_0001>
module attributes {stable_mosaic.version = 11 : i64} {
  func.func @actor_kernel(%arg0: i32, %arg1: memref<8x16xbf16, #tpu.memory_space<vmem>>, %arg2: memref<16x128xbf16, #tpu.memory_space<vmem>>, %arg3: memref<1x128xf32, #tpu.memory_space<vmem>>, %arg4: memref<128x128xbf16, #tpu.memory_space<vmem>>, %arg5: memref<1x128xf32, #tpu.memory_space<vmem>>, %arg6: memref<1x128xf32, #tpu.memory_space<vmem>>, %arg7: memref<1x128xf32, #tpu.memory_space<vmem>>, %arg8: memref<2xf32, #tpu.memory_space<smem>>, %arg9: memref<8x128xf32, #tpu.memory_space<vmem>>) attributes {dimension_semantics = [#tpu.dimension_semantics<parallel>], iteration_bounds = array<i64: 1>, scalar_prefetch = 0 : i64, scratch_operands = 0 : i64, tpu.core_type = #tpu.core_type<tc>, window_params = [{transform_indices = @transform_0, window_bounds = array<i64: 8, 16>}, {pipeline_mode = #tpu.pipeline_mode<synchronous>, transform_indices = @transform_1, window_bounds = array<i64: 16, 128>}, {pipeline_mode = #tpu.pipeline_mode<synchronous>, transform_indices = @transform_2, window_bounds = array<i64: 1, 128>}, {pipeline_mode = #tpu.pipeline_mode<synchronous>, transform_indices = @transform_3, window_bounds = array<i64: 128, 128>}, {pipeline_mode = #tpu.pipeline_mode<synchronous>, transform_indices = @transform_4, window_bounds = array<i64: 1, 128>}, {pipeline_mode = #tpu.pipeline_mode<synchronous>, transform_indices = @transform_5, window_bounds = array<i64: 1, 128>}, {pipeline_mode = #tpu.pipeline_mode<synchronous>, transform_indices = @transform_6, window_bounds = array<i64: 1, 128>}, {transform_indices = @transform_7, window_bounds = array<i64: 2>}, {transform_indices = @transform_8, window_bounds = array<i64: 8, 128>}]} {
    %c0 = arith.constant 0 : index
    %c0_0 = arith.constant 0 : index
    %0 = vector.load %arg1[%c0, %c0_0] : memref<8x16xbf16, #tpu.memory_space<vmem>>, vector<8x16xbf16>
    %c0_1 = arith.constant 0 : index
    %c0_2 = arith.constant 0 : index
    %1 = vector.load %arg2[%c0_1, %c0_2] : memref<16x128xbf16, #tpu.memory_space<vmem>>, vector<16x128xbf16>
    %cst = arith.constant dense<0.000000e+00> : vector<8x128xf32>
    %2 = tpu.matmul %0, %1, %cst {dimension_numbers = #tpu.dot_dimension_numbers<[1], [0], [0], [1], [0, 0, 1, 1], [], []>} : vector<8x16xbf16>, vector<16x128xbf16>, vector<8x128xf32> -> vector<8x128xf32>
    %c0_3 = arith.constant 0 : index
    %c0_4 = arith.constant 0 : index
    %3 = vector.load %arg3[%c0_3, %c0_4] : memref<1x128xf32, #tpu.memory_space<vmem>>, vector<1x128xf32>
    %4 = vector.broadcast %3 : vector<1x128xf32> to vector<8x128xf32>
    %5 = arith.addf %2, %4 : vector<8x128xf32>
    %6 = math.tanh %5 : vector<8x128xf32>
    %7 = arith.truncf %6 : vector<8x128xf32> to vector<8x128xbf16>
    %c0_5 = arith.constant 0 : index
    %c0_6 = arith.constant 0 : index
    %8 = vector.load %arg4[%c0_5, %c0_6] : memref<128x128xbf16, #tpu.memory_space<vmem>>, vector<128x128xbf16>
    %cst_7 = arith.constant dense<0.000000e+00> : vector<8x128xf32>
    %9 = tpu.matmul %7, %8, %cst_7 {dimension_numbers = #tpu.dot_dimension_numbers<[1], [0], [0], [1], [0, 0, 1, 1], [], []>} : vector<8x128xbf16>, vector<128x128xbf16>, vector<8x128xf32> -> vector<8x128xf32>
    %c0_8 = arith.constant 0 : index
    %c0_9 = arith.constant 0 : index
    %10 = vector.load %arg5[%c0_8, %c0_9] : memref<1x128xf32, #tpu.memory_space<vmem>>, vector<1x128xf32>
    %11 = vector.broadcast %10 : vector<1x128xf32> to vector<8x128xf32>
    %12 = arith.addf %9, %11 : vector<8x128xf32>
    %13 = math.tanh %12 : vector<8x128xf32>
    %c0_10 = arith.constant 0 : index
    %c0_11 = arith.constant 0 : index
    %14 = vector.load %arg6[%c0_10, %c0_11] : memref<1x128xf32, #tpu.memory_space<vmem>>, vector<1x128xf32>
    %15 = vector.broadcast %14 : vector<1x128xf32> to vector<8x128xf32>
    %16 = arith.mulf %13, %15 : vector<8x128xf32>
    %cst_12 = arith.constant dense<0.000000e+00> : vector<8xf32>
    %17 = vector.multi_reduction <add>, %16, %cst_12 [1] : vector<8x128xf32> to vector<8xf32>
    %18 = vector.shape_cast %17 : vector<8xf32> to vector<8x1xf32>
    %c0_13 = arith.constant 0 : index
    %19 = memref.load %arg8[%c0_13] : memref<2xf32, #tpu.memory_space<smem>>
    %20 = vector.broadcast %19 : f32 to vector<8x1xf32>
    %21 = arith.addf %18, %20 : vector<8x1xf32>
    %c0_14 = arith.constant 0 : index
    %c0_15 = arith.constant 0 : index
    %22 = vector.load %arg7[%c0_14, %c0_15] : memref<1x128xf32, #tpu.memory_space<vmem>>, vector<1x128xf32>
    %23 = vector.broadcast %22 : vector<1x128xf32> to vector<8x128xf32>
    %24 = arith.mulf %13, %23 : vector<8x128xf32>
    %cst_16 = arith.constant dense<0.000000e+00> : vector<8xf32>
    %25 = vector.multi_reduction <add>, %24, %cst_16 [1] : vector<8x128xf32> to vector<8xf32>
    %26 = vector.shape_cast %25 : vector<8xf32> to vector<8x1xf32>
    %c1 = arith.constant 1 : index
    %27 = memref.load %arg8[%c1] : memref<2xf32, #tpu.memory_space<smem>>
    %28 = vector.broadcast %27 : f32 to vector<8x1xf32>
    %29 = arith.addf %26, %28 : vector<8x1xf32>
    %30 = math.tanh %21 : vector<8x1xf32>
    %cst_17 = arith.constant 0.000000e+00 : f32
    %31 = vector.broadcast %cst_17 : f32 to vector<8x1xf32>
    %32 = arith.maximumf %29, %31 : vector<8x1xf32>
    %33 = vector.broadcast %cst_17 : f32 to vector<8x1xf32>
    %34 = arith.subf %29, %33 : vector<8x1xf32>
    %35 = arith.cmpf one, %34, %34 : vector<8x1xf32>
    %36 = vector.broadcast %cst_17 : f32 to vector<8x1xf32>
    %37 = arith.addf %29, %36 : vector<8x1xf32>
    %38 = math.absf %34 : vector<8x1xf32>
    %cst_18 = arith.constant 0.000000e+00 : f32
    %39 = vector.broadcast %cst_18 : f32 to vector<8x1xf32>
    %40 = arith.subf %39, %38 : vector<8x1xf32>
    %41 = math.exp %40 : vector<8x1xf32>
    %42 = math.log1p %41 : vector<8x1xf32>
    %43 = arith.addf %32, %42 : vector<8x1xf32>
    %44 = arith.select %35, %37, %43 : vector<8x1xi1>, vector<8x1xf32>
    %cst_19 = arith.constant 2.500000e+00 : f32
    %45 = vector.broadcast %cst_19 : f32 to vector<8x1xf32>
    %46 = arith.mulf %45, %44 : vector<8x1xf32>
    %47 = tpu.iota {dimensions = array<i32: 1>} : vector<8x128xi32>
    %c0_i32 = arith.constant 0 : i32
    %48 = vector.broadcast %c0_i32 : i32 to vector<8x128xi32>
    %49 = arith.cmpi eq, %47, %48 : vector<8x128xi32>
    %c1_i32 = arith.constant 1 : i32
    %50 = vector.broadcast %c1_i32 : i32 to vector<8x128xi32>
    %51 = arith.cmpi eq, %47, %50 : vector<8x128xi32>
    %cst_20 = arith.constant 0.000000e+00 : f32
    %52 = vector.shape_cast %46 : vector<8x1xf32> to vector<8x1xf32>
    %53 = vector.broadcast %52 : vector<8x1xf32> to vector<8x128xf32>
    %54 = vector.broadcast %cst_20 : f32 to vector<8x128xf32>
    %55 = arith.select %51, %53, %54 : vector<8x128xi1>, vector<8x128xf32>
    %56 = vector.shape_cast %30 : vector<8x1xf32> to vector<8x1xf32>
    %57 = vector.broadcast %56 : vector<8x1xf32> to vector<8x128xf32>
    %58 = arith.select %49, %57, %55 : vector<8x128xi1>, vector<8x128xf32>
    %c0_21 = arith.constant 0 : index
    %c0_22 = arith.constant 0 : index
    %59 = vector.load %arg9[%c0_21, %c0_22] : memref<8x128xf32, #tpu.memory_space<vmem>>, vector<8x128xf32>
    tpu.vector_store %arg9[%c0_21, %c0_22], %58 {strides = array<i32>} : memref<8x128xf32, #tpu.memory_space<vmem>>, vector<8x128xf32>,
    return
  }
  func.func @transform_0(%arg0: i32) -> (i32, i32) {
    %c0_i32 = arith.constant 0 : i32
    %c0_i32_0 = arith.constant 0 : i32
    return %arg0, %c0_i32 : i32, i32
  }
  func.func @transform_1(%arg0: i32) -> (i32, i32) {
    %c0_i32 = arith.constant 0 : i32
    %c0_i32_0 = arith.constant 0 : i32
    %c0_i32_1 = arith.constant 0 : i32
    return %c0_i32, %c0_i32_0 : i32, i32
  }
  func.func @transform_2(%arg0: i32) -> (i32, i32) {
    %c0_i32 = arith.constant 0 : i32
    %c0_i32_0 = arith.constant 0 : i32
    %c0_i32_1 = arith.constant 0 : i32
    return %c0_i32, %c0_i32_0 : i32, i32
  }
  func.func @transform_3(%arg0: i32) -> (i32, i32) {
    %c0_i32 = arith.constant 0 : i32
    %c0_i32_0 = arith.constant 0 : i32
    %c0_i32_1 = arith.constant 0 : i32
    return %c0_i32, %c0_i32_0 : i32, i32
  }
  func.func @transform_4(%arg0: i32) -> (i32, i32) {
    %c0_i32 = arith.constant 0 : i32
    %c0_i32_0 = arith.constant 0 : i32
    %c0_i32_1 = arith.constant 0 : i32
    return %c0_i32, %c0_i32_0 : i32, i32
  }
  func.func @transform_5(%arg0: i32) -> (i32, i32) {
    %c0_i32 = arith.constant 0 : i32
    %c0_i32_0 = arith.constant 0 : i32
    %c0_i32_1 = arith.constant 0 : i32
    return %c0_i32, %c0_i32_0 : i32, i32
  }
  func.func @transform_6(%arg0: i32) -> (i32, i32) {
    %c0_i32 = arith.constant 0 : i32
    %c0_i32_0 = arith.constant 0 : i32
    %c0_i32_1 = arith.constant 0 : i32
    return %c0_i32, %c0_i32_0 : i32, i32
  }
  func.func @transform_7(%arg0: i32) -> i32 {
    %c0_i32 = arith.constant 0 : i32
    %c0_i32_0 = arith.constant 0 : i32
    return %c0_i32 : i32
  }
  func.func @transform_8(%arg0: i32) -> (i32, i32) {
    %c0_i32 = arith.constant 0 : i32
    %c0_i32_0 = arith.constant 0 : i32
    return %arg0, %c0_i32 : i32, i32
  }
}

</mosaic_0001>

<bundles_post_ra>
// kernel: actor_forward.1
= control target key start
LH: loop header
LB: loop body
LE: loop exit
PB: predicated region body
PF: predicated region fallthrough
CT: control target
= control target key end

     0   :  { %13 = vsyncpa [#allocation3], 0  ;;  %s492_s0 = inlined_call_operand.vmem [shape: bf16[8,16], index: 0, kind: input, shape index: {}]   ;;  %s493_s1 = inlined_call_operand.vmem [shape: bf16[16,128], index: 1, kind: input, shape index: {}]   ;;  %s494_s2 = inlined_call_operand.vmem [shape: f32[1,128], index: 2, kind: input, shape index: {}]   ;;  %s495_s3 = inlined_call_operand.hbm [shape: bf16[128,128], index: 3, kind: input, shape index: {}]   ;;  %s496_s4 = inlined_call_operand.vmem [shape: f32[1,128], index: 4, kind: input, shape index: {}]   ;;  %s497_s5 = inlined_call_operand.vmem [shape: f32[1,128], index: 5, kind: input, shape index: {}]   ;;  %s498_s6 = inlined_call_operand.vmem [shape: f32[1,128], index: 6, kind: input, shape index: {}]   ;;  %s499_s7 = inlined_call_operand.vmem [shape: f32[2], index: 7, kind: input, shape index: {}]   ;;  %s500_s8 = inlined_call_operand.vmem [shape: f32[8,128], index: 8, kind: output, shape index: {}]  }
   0x1   :  { %14 = vsyncpa [#allocation4], 0  ;;  %s405_s27 = smov [#allocation2]   ;;  %s45_s9 = sshll.u32 %s499_s7, 4  ;;  %s46_s9 = int_to_ptr.vmem [resolvable:$true] %s45_s9 }
   0x2   :  { %s26_s28 = sshll.u32 %s405_s27, 4  ;;  %s367_s12 = scalar_lea.hbm %s495_s3, 1024  ;;  %s27_s28 = int_to_ptr.vmem [resolvable:$true] %s26_s28 }
   0x3   :  { %p368_p0 = scmp.ne.s32.totalorder %s495_s3, %s367_s12  ;;  %p371_p1 = scmp.lt.u32.totalorder %s367_s12, %s495_s3 }
   0x5   :  { %p373_p2 = pnand %p371_p1, %p368_p0 }
   0x7   :  { %376 = shalt.err (!%p373_p2)
}
   0x8   :  { %s377_s17 = scalar_lea.vmem %s27_s28, 1024  ;;  %p382_p4 = scmp.lt.s32.totalorder %s27_s28, %s27_s28 }
   0x9   :  { %p378_p3 = scmp.ne.s32.totalorder %s27_s28, %s377_s17  ;;  %p383_p5 = scmp.lt.s32.totalorder %s377_s17, %s377_s17 }
   0xb   :  { %p384_p6 = por %p383_p5, %p382_p4 }
   0xd   :  { %p385_p7 = pnand %p384_p6, %p378_p3 }
   0xf   :  { %388 = shalt.err (!%p385_p7)
}
  0x10   :  { %s406_s7 = smov 64   ;;  %s407_s18 = smov 4  }
  0x11   :  { %32 = dma.hbm_to_vmem [thread:$0]  %s495_s3, 1024, %s27_s28, [#allocation3], %s406_s7, %s406_s7, %s407_s18  }
  0x12   :  { %s389_s21 = scalar_lea.vmem %s46_s9, 16  ;;  %p394_p9 = scmp.lt.s32.totalorder %s46_s9, %s46_s9 }
  0x13   :  { %p390_p8 = scmp.ne.s32.totalorder %s46_s9, %s389_s21  ;;  %p395_p10 = scmp.lt.s32.totalorder %s389_s21, %s389_s21 }
  0x15   :  { %p396_p11 = por %p395_p10, %p394_p9 }
  0x17   :  { %p397_p12 = pnand %p396_p11, %p390_p8 }
  0x19   :  { %400 = shalt.err (!%p397_p12)
}
  0x1a   :  { %s408_s22 = smov [#allocation5]  }
  0x1b   :  { %48 = dma.vmem_to_smem %s46_s9, 16, %s408_s22, [#allocation4]  }
  0x1c   :  { %401 = dma.done.wait [#allocation3], 1024  }
  0x1d   :  { %402 = vsyncadd [#allocation3], 4294966272 }
  0x1e   :  { %403 = dma.done.wait [#allocation4], 16  }
  0x1f   :  { %404 = vsyncadd [#allocation4], 4294967280 }
  0x20   :  { %55 = sfence }
  0x21   :  { %v348_v0 = vld [vmem:[%s493_s1] sm:$0xff]   ;;  %v409_v1 = vmov 0.0   ;;  %vm410_vm0 = vmmov 0   ;;  %vm73_vm1 = vcmask 130048   ;;  %v350_v4 = vld [vmem:[#allocation2 + $0x8] sm:$0xff]   ;;  %v351_v5 = vld [vmem:[#allocation2 + $0x10] sm:$0xff]   ;;  %v277_v43 = vlaneseq }
  0x22   :  { %316 = vmatprep.subr.bf16.mxu0 %v409_v1  ;;  %v57_v2 = vld [vmem:[%s492_s0] sm:$0xf]  ;;  %322 = vmatprep.subr.bf16.mxu1 %v409_v1  ;;  %v352_v6 = vld [vmem:[#allocation2 + $0x18] sm:$0xff]   ;;  %v354_v8 = vld [vmem:[#allocation2 + $0x28] sm:$0xff]   ;;  %s241_s9 = sld [smem:[#allocation5]] }
  0x23   :  { %317 = vmatpush3.bf16.msra.mxu0 %v348_v0  ;;  %318 = vmatprep.mubr.msk.bf16.mxu0 %vm410_vm0, %v409_v1  ;;  %v349_v3 = vld [vmem:[#allocation2] sm:$0xff]   ;;  %v355_v9 = vld [vmem:[#allocation2 + $0x30] sm:$0xff]   ;;  %v356_v10 = vld [vmem:[#allocation2 + $0x38] sm:$0xff]   ;;  %v278_v48 = vand.u32 127, %v277_v43 }
  0x24   :  { %338 = vmatprep.mubr.msk.bf16.mxu1 %vm410_vm0, %v409_v1  ;;  %323 = vmatpush3.bf16.msra.mxu1 %v349_v3  ;;  %v353_v7 = vld [vmem:[#allocation2 + $0x20] sm:$0xff]  }
  0x25   :  { %324 = vmatprep.subr.bf16.mxu1 %v409_v1  ;;  %v290_v11 = vld [vmem:[%s494_s2] ss:$0 sm:$0xff]  ;;  %vm280_vm4 = vcmp.eq.s32.totalorder %v278_v48, 1  ;;  %vm279_vm5 = vcmp.eq.s32.totalorder %v278_v48, 0 }
  0x26   :  { %319 = vmatmul.mubr.msk.bf16.vlgmr.msra.gmra.mrb[0].mxu0 %vm73_vm1, %v57_v2  ;;  %v293_v19 = vld [vmem:[%s496_s4] ss:$0 sm:$0xff]  ;;  %s304_s4 = sld [smem:[#allocation5 + $0x1]] }
  0x27   :  { %v303_v25 = vld [vmem:[%s498_s6] ss:$0 sm:$0xff] }
  0x28   :  { %325 = vmatpush3.bf16.msra.mxu1 %v350_v4  ;;  %v302_v28 = vld [vmem:[%s497_s5] ss:$0 sm:$0xff]  ;;  %v242_v38 = vstv %s241_s9 }
  0x29   :  { %326 = vmatprep.subr.bf16.mxu1 %v409_v1 }
  0x2c   :  { %327 = vmatpush3.bf16.msra.mxu1 %v351_v5  ;;  %v255_v30 = vstv %s304_s4 }
  0x2d   :  { %328 = vmatprep.subr.bf16.mxu1 %v409_v1 }
  0x30   :  { %329 = vmatpush3.bf16.msra.mxu1 %v352_v6 }
  0x31   :  { %330 = vmatprep.subr.bf16.mxu1 %v409_v1 }
  0x34   :  { %331 = vmatpush3.bf16.msra.mxu1 %v353_v7 }
  0x35   :  { %332 = vmatprep.subr.bf16.mxu1 %v409_v1 }
  0x38   :  { %333 = vmatpush3.bf16.msra.mxu1 %v354_v8 }
  0x39   :  { %334 = vmatprep.subr.bf16.mxu1 %v409_v1 }
  0x3c   :  { %335 = vmatpush3.bf16.msra.mxu1 %v355_v9 }
  0x3d   :  { %336 = vmatprep.subr.bf16.mxu1 %v409_v1 }
  0x40   :  { %337 = vmatpush3.bf16.msra.mxu1 %v356_v10 }
  0xf9   :  { %v111_v12 = vpop.f32.mrb[0].mxu0 }
  0xfa   :  { %v112_v13 = vadd.f32 %v290_v11, %v111_v12  ;;  %v320_v14 = vpop.f32.mrb[1].mxu0 }
  0xfb   :  { %v114_v15 = vpop.f32.mrb[2].mxu0 }
  0xfc   :  { %357 = vtanh.f32 %v112_v13  ;;  %v321_v16 = vpop.f32.mrb[3].mxu0 }
 0x106   :  { %v358_v17 = vpop.eup %357 }
 0x107   :  { %v118_v18 = vpack.c.bf16 %v358_v17, %v358_v17 }
 0x109   :  { %339 = vmatmul.mubr.bf16.vlgmr.msra.gmra.mrb[0].mxu1 %v118_v18 }
 0x1dc   :  { %v224_v20 = vpop.f32.mrb[0].mxu1 }
 0x1dd   :  { %v225_v21 = vadd.f32 %v293_v19, %v224_v20  ;;  %v340_v22 = vpop.f32.mrb[1].mxu1 }
 0x1de   :  { %v227_v23 = vpop.f32.mrb[2].mxu1 }
 0x1df   :  { %359 = vtanh.f32 %v225_v21  ;;  %v341_v24 = vpop.f32.mrb[3].mxu1 }
 0x1e9   :  { %v360_v26 = vpop.eup %359 }
 0x1ea   :  { %v251_v27 = vmul.f32 %v360_v26, %v303_v25  ;;  %v238_v29 = vmul.f32 %v360_v26, %v302_v28 }
 0x1ec   :  { %252 = vadd.xlane.f32.xlu0 %v251_v27 }
 0x1f0   :  { %239 = vadd.xlane.f32.xlu0 %v238_v29 }
 0x279   :  { %v253_v31 = vpop.xlane.xlu0 %252 }
 0x27a   :  { %v256_v32 = vadd.f32 %v255_v30, %v253_v31 }
 0x27c   :  { %v261_v33 = vand.u32 2147483647, %v256_v32  ;;  %v258_v49 = vmax.f32 %v256_v32, 0.0  ;;  %vm259_vm3 = vcmp.ne.f32.partialorder %v256_v32, %v256_v32 }
 0x27d   :  { %v240_v39 = vpop.xlane.xlu0 %239 }
 0x27e   :  { %v262_v34 = vsub.f32 0.0, %v261_v33  ;;  %v243_v41 = vadd.f32 %v242_v38, %v240_v39 }
 0x280   :  { %v263_v35 = vmul.f32 1.442695, %v262_v34 }
 0x282   :  { %361 = vpow2.f32 %v263_v35 }
 0x28c   :  { %v362_v36 = vpop.eup %361 }
 0x28d   :  { %v265_v37 = vadd.f32 1.0, %v362_v36  ;;  %v268_v40 = vmul.f32 -0.5, %v362_v36  ;;  %v271_v44 = vand.u32 2147483647, %v362_v36 }
 0x28f   :  { %363 = vlog2.f32 %v265_v37  ;;  %v269_v42 = vadd.f32 1.0, %v268_v40  ;;  %vm272_vm2 = vcmp.lt.f32.partialorder %v271_v44, 0.0004427343 }
 0x290   :  { %365 = vtanh.f32 %v243_v41 }
 0x291   :  { %v270_v47 = vmul.f32 %v362_v36, %v269_v42 }
 0x299   :  { %v364_v45 = vpop.eup %363 }
 0x29a   :  { %v267_v46 = vmul.f32 0.6931472, %v364_v45  ;;  %v366_v54 = vpop.eup %365 }
 0x29c   :  { %v273_v50 = vsel %vm272_vm2, %v270_v47, %v267_v46 }
 0x29d   :  { %v274_v51 = vadd.f32 %v273_v50, %v258_v49 }
 0x29f   :  { %v275_v52 = vsel %vm259_vm3, %v256_v32, %v274_v51 }
 0x2a0   :  { %v276_v53 = vmul.f32 2.5, %v275_v52 }
 0x2a2   :  { %v281_v55 = vsel %vm280_vm4, %v276_v53, 0.0 }
 0x2a3   :  { %v282_v56 = vsel %vm279_vm5, %v366_v54, %v281_v55 }
 0x2a4   :  { %283 = vst [vmem:[%s500_s8] sm:$0xff] %v282_v56 }
 0x2a5   :  { %288 = vsyncpa [#allocation3], 1 }
 0x2a6   :  { %289 = vsyncpa [#allocation4], 1 }

</bundles_post_ra>
